<compile_context>
chip_gen: v7x
topology: tpu7x:2x2x1
jax: 0.10.0
libtpu: 0.0.40
codegen_flags: <defaults>
</compile_context>

<pallas_src>
import math

import jax
import jax.numpy as jnp
from jax.experimental import pallas as pl
from jax.experimental.pallas import tpu as pltpu


def _round_up(v, m):
    return (v + m - 1) // m * m


def _cdiv(a, b):
    return (a + b - 1) // b


def _downsample_kernel(p_ref, h_ref, w1_ref, w2_ref, b_ref, o_ref):
    # p_ref : (1, TH, Wow, 6C)  stacked planes [p00, p01, p00s, p10, p11, p10s]
    # h_ref : (1, 1,  Wow, 6C)  plane row (i+1)*TH (halo for the kh=2 taps)
    # w1_ref: (6C, Cout)        taps (kh=0, kw=0..2) and (kh=1, kw=0..2)
    # w2_ref: (3C, Cout)        taps (kh=2, kw=0..2)
    # b_ref : (1, Cout)         bias (f32)
    # o_ref : (1, Cout, TH*Wow) output tile, flattened NCHW rows (lane-dense store)
    _, TH, Wow, C6 = p_ref.shape
    C3 = C6 // 2
    Cout = o_ref.shape[1]
    M = TH * Wow

    blk = p_ref[0]                                       # (TH, Wow, 6C)

    # kh = 0, 1 taps: one matmul, K = 6C (Wow % 8 == 0 -> the reshape is dense).
    acc = jnp.dot(blk.reshape(M, C6), w1_ref[...],
                  preferred_element_type=jnp.float32)

    # kh = 2 taps read plane rows r+1 and only the [p00, p01, p00s] channel groups.
    halo = h_ref[0][:, :, :C3]                           # (1, Wow, 3C)
    if TH > 1:
        dn = jnp.concatenate([blk[1:, :, :C3], halo], axis=0)   # (TH, Wow, 3C)
    else:
        dn = halo
    acc = acc + jnp.dot(dn.reshape(M, C3), w2_ref[...],
                        preferred_element_type=jnp.float32)

    acc = acc + b_ref[...].astype(jnp.float32)           # (1, Cout) broadcast
    # Cast before the (M, Cout) -> (Cout, M) transpose (halves XLU bytes for bf16).
    o_ref[...] = acc.astype(o_ref.dtype).T.reshape(1, Cout, M)


def _vmem_capacity_bytes():
    try:
        return int(pltpu.get_tpu_info().vmem_capacity_bytes)
    except Exception:
        return 64 << 20                     # conservative (v7x-sized) fallback


def _est_vmem_bytes(th, Wow, C, Cout, itemsize):
    """Honest per-step VMEM estimate: double-buffered blocks + weights + scratch, lane-padded."""
    c6 = _round_up(6 * C, 128)
    c3 = _round_up(3 * C, 128)
    co = _round_up(Cout, 128)
    m = th * Wow
    plane = th * Wow * c6 * itemsize
    halo = Wow * c6 * itemsize
    outb = _round_up(Cout, 8) * _round_up(m, 128) * itemsize
    wts = (_round_up(6 * C, 8) + _round_up(3 * C, 8)) * co * itemsize + 8 * co * 4
    acc = _round_up(m, 8) * co * 4          # f32 accumulator
    dn = th * Wow * c3 * itemsize           # kh=2 operand copy
    return 2 * (plane + halo + outb + wts) + acc + dn + (2 << 20)


def _pick_row_tile(Ho, Wow, B, C, Cout, itemsize, budget):
    # When nt > 1 the flat output block's minor dim (th*Wow) must be a multiple of 128
    # for full-width stores, so th must be a multiple of `step`.
    step = max(8, 128 // math.gcd(Wow, 128))

    def fits(th):
        return _est_vmem_bytes(th, Wow, C, Cout, itemsize) <= budget

    if Ho <= step or fits(Ho):
        th = Ho
    else:
        th = step
        while th + step < Ho and fits(th + step):
            th += step
        # Rebalance so padded rows are minimal for the chosen number of tiles.
        nt = _cdiv(Ho, th)
        th = min(th, _round_up(_cdiv(Ho, nt), step))

    # Give the pipeline / second TensorCore (v7x) at least 2 grid steps when possible.
    if B * _cdiv(Ho, th) < 2 and Ho > step:
        t = _round_up(max(Ho // 2, 1), step)
        if t < Ho:
            th = t
    return th


def downsample(x_nchw, weight, bias):
    """Downsample.forward: x = F.pad(x, (0,1,0,1)); x = Conv2d(C, C, 3, stride=2)(x)."""
    B, C, H, W = x_nchw.shape
    Cout = weight.shape[0]
    assert weight.shape == (Cout, C, 3, 3) and H >= 2 and W >= 2

    dt = x_nchw.dtype
    itemsize = jnp.dtype(dt).itemsize
    Ho, Wo = H // 2, W // 2                 # = (H + 1 - 3)//2 + 1 for the (0,1,0,1) pad

    # ---- single fused plane construction --------------------------------------
    He, We = H + (H % 2), W + (W % 2)
    x = x_nchw
    if (He, We) != (H, W):                  # part of the (0,1,0,1) zero padding
        x = jnp.pad(x, ((0, 0), (0, 0), (0, He - H), (0, We - W)))
    Hq, Wq = He // 2, We // 2
    Wow = _round_up(Wq, 8)                  # sublane-dense plane width (junk cols trimmed)

    cap = _vmem_capacity_bytes()
    th = _pick_row_tile(Ho, Wow, B, C, Cout, itemsize, budget=int(cap * 0.30))
    nt = _cdiv(Ho, th)
    Hp = nt * th                            # padded output rows
    Hpad = Hp + 1                           # +1 halo row (the conv's bottom zero-pad row)

    # p{hp}{wp}[b, r, q, c] = x_pad[b, c, 2r+hp, 2q+wp]  (channels last).
    p = jnp.transpose(x.reshape(B, C, Hq, 2, Wq, 2), (0, 2, 4, 3, 5, 1))
    p00, p01 = p[:, :, :, 0, 0, :], p[:, :, :, 0, 1, :]
    p10, p11 = p[:, :, :, 1, 0, :], p[:, :, :, 1, 1, :]
    zcol = jnp.zeros((B, Hq, 1, C), dt)
    p00s = jnp.concatenate([p00[:, :, 1:, :], zcol], axis=2)   # x_pad[2r,   2q+2]
    p10s = jnp.concatenate([p10[:, :, 1:, :], zcol], axis=2)   # x_pad[2r+1, 2q+2]
    planes = jnp.concatenate([p00, p01, p00s, p10, p11, p10s], axis=-1)
    planes = jnp.pad(planes, ((0, 0), (0, Hpad - Hq), (0, Wow - Wq), (0, 0)))
    # planes: (B, Hpad, Wow, 6C); rows >= Ho / cols >= Wo realise the zero padding.

    # Weights packed so one matmul covers the kh=0,1 taps and one the kh=2 taps.
    wt = jnp.transpose(weight, (2, 3, 1, 0)).astype(dt)        # (kh, kw, Cin, Cout)
    w1 = wt[:2].reshape(6 * C, Cout)
    w2 = wt[2].reshape(3 * C, Cout)
    b_mat = bias.astype(jnp.float32).reshape(1, Cout)

    est = _est_vmem_bytes(th, Wow, C, Cout, itemsize)
    vmem_limit = int(min(cap - (8 << 20), max(32 << 20, int(est * 1.4) + (4 << 20))))

    plane_spec = pl.BlockSpec((1, th, Wow, 6 * C), lambda b, i: (b, i, 0, 0))
    halo_spec = pl.BlockSpec((1, 1, Wow, 6 * C), lambda b, i: (b, (i + 1) * th, 0, 0))

    out_flat = pl.pallas_call(
        _downsample_kernel,
        out_shape=jax.ShapeDtypeStruct((B, Cout, Hp * Wow), dt),
        grid=(B, nt),
        in_specs=[plane_spec, halo_spec,
                  pl.BlockSpec((6 * C, Cout), lambda b, i: (0, 0)),
                  pl.BlockSpec((3 * C, Cout), lambda b, i: (0, 0)),
                  pl.BlockSpec((1, Cout), lambda b, i: (0, 0))],
        out_specs=pl.BlockSpec((1, Cout, th * Wow), lambda b, i: (b, 0, i)),
        compiler_params=pltpu.CompilerParams(
            dimension_semantics=("parallel", "parallel"),
            vmem_limit_bytes=vmem_limit),
    )(planes, planes, w1, w2, b_mat)

    # (B, Cout, Hp*Wow) -> NCHW: free reshape; slice only trims padding rows/cols.
    out = out_flat.reshape(B, Cout, Hp, Wow)
    if Hp != Ho or Wow != Wo:
        out = out[:, :, :Ho, :Wo]
    return out


if __name__ == "__main__":
    key = jax.random.PRNGKey(0)
    B, C, H, W = 2, 4, 16, 16
    kx, kw_, kb = jax.random.split(key, 3)

    x = jax.random.normal(kx, (B, C, H, W), dtype=jnp.float32)

    # Deterministic init mimicking PyTorch Conv2d default (uniform +/- 1/sqrt(fan_in)).
    fan_in = float(C * 3 * 3)
    bound = 1.0 / (fan_in ** 0.5)
    weight = jax.random.uniform(kw_, (C, C, 3, 3), minval=-bound, maxval=bound,
                                dtype=jnp.float32)
    bias = jax.random.uniform(kb, (C,), minval=-bound, maxval=bound, dtype=jnp.float32)

    out = jax.block_until_ready(jax.jit(downsample)(x, weight, bias))

    Ho, Wo = H // 2, W // 2
    assert out.shape == (B, C, Ho, Wo), out.shape

    # Reference: XLA conv on the identically padded input.
    x_pad = jnp.pad(x, ((0, 0), (0, 0), (0, 1), (0, 1)))
    ref = jax.lax.conv_general_dilated(
        x_pad, weight, window_strides=(2, 2), padding="VALID",
        dimension_numbers=("NCHW", "OIHW", "NCHW")) + bias[None, :, None, None]
    err = float(jnp.max(jnp.abs(out - ref)))
    assert jnp.allclose(out, ref, atol=1e-4, rtol=1e-4), err

    print("KERNEL_OK")
</pallas_src>

<mosaic_0001>
module attributes {stable_mosaic.version = 11 : i64} {
  func.func @_downsample_kernel(%arg0: i32, %arg1: i32, %arg2: memref<1x8x8x24xf32, #tpu.memory_space<vmem>>, %arg3: memref<1x1x8x24xf32, #tpu.memory_space<vmem>>, %arg4: memref<24x4xf32, #tpu.memory_space<vmem>>, %arg5: memref<12x4xf32, #tpu.memory_space<vmem>>, %arg6: memref<1x4xf32, #tpu.memory_space<vmem>>, %arg7: memref<1x4x64xf32, #tpu.memory_space<vmem>>) attributes {dimension_semantics = [#tpu.dimension_semantics<parallel>, #tpu.dimension_semantics<parallel>], iteration_bounds = array<i64: 2, 1>, scalar_prefetch = 0 : i64, scratch_operands = 0 : i64, tpu.core_type = #tpu.core_type<tc>, window_params = [{transform_indices = @transform_0, window_bounds = array<i64: 1, 8, 8, 24>}, {transform_indices = @transform_1, window_bounds = array<i64: 1, 1, 8, 24>}, {pipeline_mode = #tpu.pipeline_mode<synchronous>, transform_indices = @transform_2, window_bounds = array<i64: 24, 4>}, {pipeline_mode = #tpu.pipeline_mode<synchronous>, transform_indices = @transform_3, window_bounds = array<i64: 12, 4>}, {pipeline_mode = #tpu.pipeline_mode<synchronous>, transform_indices = @transform_4, window_bounds = array<i64: 1, 4>}, {transform_indices = @transform_5, window_bounds = array<i64: 1, 4, 64>}]} {
    %c0 = arith.constant 0 : index
    %c0_0 = arith.constant 0 : index
    %c0_1 = arith.constant 0 : index
    %c0_2 = arith.constant 0 : index
    %0 = vector.load %arg2[%c0, %c0_0, %c0_1, %c0_2] : memref<1x8x8x24xf32, #tpu.memory_space<vmem>>, vector<1x8x8x24xf32>
    %1 = vector.shape_cast %0 : vector<1x8x8x24xf32> to vector<8x8x24xf32>
    %2 = vector.shape_cast %1 : vector<8x8x24xf32> to vector<64x24xf32>
    %c0_3 = arith.constant 0 : index
    %c0_4 = arith.constant 0 : index
    %3 = vector.load %arg4[%c0_3, %c0_4] : memref<24x4xf32, #tpu.memory_space<vmem>>, vector<24x4xf32>
    %cst = arith.constant dense<0.000000e+00> : vector<64x4xf32>
    %4 = tpu.matmul %2, %3, %cst {dimension_numbers = #tpu.dot_dimension_numbers<[1], [0], [0], [1], [0, 0, 1, 1], [], []>} : vector<64x24xf32>, vector<24x4xf32>, vector<64x4xf32> -> vector<64x4xf32>
    %c0_5 = arith.constant 0 : index
    %c0_6 = arith.constant 0 : index
    %c0_7 = arith.constant 0 : index
    %c0_8 = arith.constant 0 : index
    %5 = vector.load %arg3[%c0_5, %c0_6, %c0_7, %c0_8] : memref<1x1x8x24xf32, #tpu.memory_space<vmem>>, vector<1x1x8x24xf32>
    %6 = vector.shape_cast %5 : vector<1x1x8x24xf32> to vector<1x8x24xf32>
    %7 = vector.extract_strided_slice %6 {offsets = [0, 0, 0], sizes = [1, 8, 12], strides = [1, 1, 1]} : vector<1x8x24xf32> to vector<1x8x12xf32>
    %8 = vector.extract_strided_slice %1 {offsets = [1, 0, 0], sizes = [7, 8, 12], strides = [1, 1, 1]} : vector<8x8x24xf32> to vector<7x8x12xf32>
    %9 = tpu.concatenate %8, %7 in 0 : vector<7x8x12xf32>, vector<1x8x12xf32> -> vector<8x8x12xf32>
    %10 = vector.shape_cast %9 : vector<8x8x12xf32> to vector<64x12xf32>
    %c0_9 = arith.constant 0 : index
    %c0_10 = arith.constant 0 : index
    %11 = vector.load %arg5[%c0_9, %c0_10] : memref<12x4xf32, #tpu.memory_space<vmem>>, vector<12x4xf32>
    %cst_11 = arith.constant dense<0.000000e+00> : vector<64x4xf32>
    %12 = tpu.matmul %10, %11, %cst_11 {dimension_numbers = #tpu.dot_dimension_numbers<[1], [0], [0], [1], [0, 0, 1, 1], [], []>} : vector<64x12xf32>, vector<12x4xf32>, vector<64x4xf32> -> vector<64x4xf32>
    %13 = arith.addf %4, %12 : vector<64x4xf32>
    %c0_12 = arith.constant 0 : index
    %c0_13 = arith.constant 0 : index
    %14 = vector.load %arg6[%c0_12, %c0_13] : memref<1x4xf32, #tpu.memory_space<vmem>>, vector<1x4xf32>
    %15 = vector.broadcast %14 : vector<1x4xf32> to vector<64x4xf32>
    %16 = arith.addf %13, %15 : vector<64x4xf32>
    %17 = tpu.transpose %16, [1, 0] : vector<64x4xf32> -> vector<4x64xf32>
    %18 = vector.shape_cast %17 : vector<4x64xf32> to vector<1x4x64xf32>
    %c0_14 = arith.constant 0 : index
    %c0_15 = arith.constant 0 : index
    %c0_16 = arith.constant 0 : index
    %19 = vector.load %arg7[%c0_14, %c0_15, %c0_16] : memref<1x4x64xf32, #tpu.memory_space<vmem>>, vector<1x4x64xf32>
    tpu.vector_store %arg7[%c0_14, %c0_15, %c0_16], %18 {strides = array<i32>} : memref<1x4x64xf32, #tpu.memory_space<vmem>>, vector<1x4x64xf32>,
    return
  }
  func.func @transform_0(%arg0: i32, %arg1: i32) -> (i32, i32, i32, i32) {
    %c0_i32 = arith.constant 0 : i32
    %c0_i32_0 = arith.constant 0 : i32
    %c0_i32_1 = arith.constant 0 : i32
    return %arg0, %arg1, %c0_i32, %c0_i32_0 : i32, i32, i32, i32
  }
  func.func @transform_1(%arg0: i32, %arg1: i32) -> (i32, i32, i32, i32) {
    %c1_i32 = arith.constant 1 : i32
    %0 = arith.addi %arg1, %c1_i32 : i32
    %c8_i32 = arith.constant 8 : i32
    %1 = arith.muli %0, %c8_i32 : i32
    %c0_i32 = arith.constant 0 : i32
    %c0_i32_0 = arith.constant 0 : i32
    %c0_i32_1 = arith.constant 0 : i32
    return %arg0, %1, %c0_i32, %c0_i32_0 : i32, i32, i32, i32
  }
  func.func @transform_2(%arg0: i32, %arg1: i32) -> (i32, i32) {
    %c0_i32 = arith.constant 0 : i32
    %c0_i32_0 = arith.constant 0 : i32
    %c0_i32_1 = arith.constant 0 : i32
    return %c0_i32, %c0_i32_0 : i32, i32
  }
  func.func @transform_3(%arg0: i32, %arg1: i32) -> (i32, i32) {
    %c0_i32 = arith.constant 0 : i32
    %c0_i32_0 = arith.constant 0 : i32
    %c0_i32_1 = arith.constant 0 : i32
    return %c0_i32, %c0_i32_0 : i32, i32
  }
  func.func @transform_4(%arg0: i32, %arg1: i32) -> (i32, i32) {
    %c0_i32 = arith.constant 0 : i32
    %c0_i32_0 = arith.constant 0 : i32
    %c0_i32_1 = arith.constant 0 : i32
    return %c0_i32, %c0_i32_0 : i32, i32
  }
  func.func @transform_5(%arg0: i32, %arg1: i32) -> (i32, i32, i32) {
    %c0_i32 = arith.constant 0 : i32
    %c0_i32_0 = arith.constant 0 : i32
    return %arg0, %c0_i32, %arg1 : i32, i32, i32
  }
}

</mosaic_0001>

<bundles_post_ra>
// kernel: downsample.1
= control target key start
LH: loop header
LB: loop body
LE: loop exit
PB: predicated region body
PF: predicated region fallthrough
CT: control target
= control target key end

     0   :  { %s926_s18 = smov 0   ;;  %s928_s19 = smov 0   ;;  %s1000_s0 = inlined_call_operand.vmem [shape: f32[2,9,8,24], index: 0, kind: input, shape index: {}, may-alias: {0,1}]   ;;  %s1001_s1 = inlined_call_operand.vmem [shape: f32[2,9,8,24], index: 1, kind: input, shape index: {}, may-alias: {0,1}]   ;;  %s1002_s2 = inlined_call_operand.vmem [shape: f32[24,4], index: 2, kind: input, shape index: {}]   ;;  %s1003_s3 = inlined_call_operand.vmem [shape: f32[12,4], index: 3, kind: input, shape index: {}]   ;;  %s1004_s4 = inlined_call_operand.vmem [shape: f32[1,4], index: 4, kind: input, shape index: {}]   ;;  %s1005_s5 = inlined_call_operand.vmem [shape: f32[2,4,64], index: 5, kind: output, shape index: {}]  }
   0x1   :  { %s930_s20 = smov 0  }
   0x2 LB: > { %s27_s21 = sadd.s32 1, %s889_s19  ;;  %p743_p0 = scmp.ge.s32.totalorder %s893_s20, 1  ;;  %s893_s20 = sphi %s930_s20, %s15_s20   ;;  %s889_s19 = sphi %s928_s19, %s1007_s19   ;;  %s885_s18 = sphi %s926_s18, %s1006_s18  }
   0x3   : > { %p29_p1 = scmp.ge.s32.totalorder %s27_s21, 2  ;;  %p239_p2 = scmp.lt.s32.totalorder %s893_s20, 3 }
   0x5   : > { %s1009_s21 = smov (%p29_p1, %s27_s21), 0  ;;  %p240_p3 = pnand %p743_p0, %p239_p2 }
   0x6   : > { %v332_v0 = vld [vmem:[%s1002_s2] sm:$0xff] (!%p240_p3)  ;;  %v333_v1 = vld [vmem:[%s1002_s2 + $0x8] sm:$0xff] (!%p240_p3)  ;;  %vm363_vm0 = vcmask (!%p240_p3), 1043456   ;;  %p292_p4 = scmp.lt.s32.totalorder (!%p240_p3), %s885_s18, 1  ;;  %vm895_vm1 = vmmov (!%p240_p3), 1   ;;  %v334_v6 = vld [vmem:[%s1002_s2 + $0x10] sm:$0xff] (!%p240_p3) }
   0x7   : > { %243 = sbr.rel (%p240_p3) target bundleno = 367 (0x16f), region = 40  ;;  %v336_v2 = vld [vmem:[%s1003_s3] sm:$0xff] (!%p240_p3)  ;;  %v830_v3 = vpack.c.bf16 (!%p240_p3), %v333_v1, %v332_v0  ;;  %v337_v4 = vld [vmem:[%s1003_s3 + $0x8] sm:$0xf] (!%p240_p3)  ;;  %vm825_vm2 = vmpackc.low (!%p240_p3), %vm363_vm0, %vm895_vm1  ;;  %vm338_vm3 = vcmask (!%p240_p3), 97280   ;;  %vm472_vm4 = vcmask (!%p240_p3), 195584  }
   0x8   : > { %v824_v5 = vpack.c.bf16 (!%p240_p3), %v337_v4, %v336_v2  ;;  %v764_v21 = vld [vmem:[%s1004_s4] ss:$0 sm:$0xff] (!%p240_p3)  ;;  %vm642_vm5 = vcmask (!%p240_p3), 519168  }
   0x9   : > { %831 = vmatprep.subr.bf16.mxu0 (!%p240_p3), %v830_v3 }
   0xa   : > { %833 = vmatpush3.bf16.msra.mxu0 (!%p240_p3), %v830_v3  ;;  %826 = vmatprep.subr.msk.bf16.mxu1 (!%p240_p3), %vm825_vm2, %v824_v5 }
   0xb   : > { %829 = vmatpush3.bf16.msk.msra.mxu1 (!%p240_p3), %vm825_vm2, %v824_v5  ;;  %810 = vmatprep.subr.mxu0 (!%p240_p3), %v334_v6 }
   0xe   : > { %s1011_s18 = smov (!%p292_p4, %s885_s18), 1  ;;  %811 = vmatpush3.msra.mxu0 %v334_v6 }
   0xf   : > { %s842_s7 = smul.u32 72, %s1011_s18  ;;  %s746_s17 = sshll.u32 %s1011_s18, 2 }
  0x10   : > { %s323_s24 = scalar_lea.vmem %s1005_s5, %s746_s17 }
  0x11   : > { %s299_s10 = scalar_lea.vmem %s1000_s0, %s842_s7  ;;  %s768_s11 = sadd.s32 64, %s842_s7 }
  0x12   : > { %v325_v7 = vld [vmem:[%s299_s10 + $0x8] sm:$0xff]  ;;  %v324_v8 = vld [vmem:[%s299_s10] sm:$0xff]  ;;  %v326_v9 = vld [vmem:[%s299_s10 + $0x10] sm:$0xff]  ;;  %s314_s14 = scalar_lea.vmem %s1001_s1, %s768_s11 }
  0x13   : > { %794 = vmatprep.mubr.msk.f32.mxu1 %vm338_vm3, %v325_v7  ;;  %v327_v10 = vld [vmem:[%s299_s10 + $0x18] sm:$0xff]  ;;  %812 = vmatprep.mubr.msk.f32.mxu0 %vm472_vm4, %v324_v8  ;;  %v328_v11 = vld [vmem:[%s299_s10 + $0x20] sm:$0xff]  ;;  %v329_v12 = vld [vmem:[%s299_s10 + $0x28] sm:$0xff] }
  0x14   : > { %795 = vmatmul.mubr.msk.f32.vlgmr.msra.gmra.mrb[0].mxu1 %vm338_vm3, %v326_v9  ;;  %813 = vmatmul.mubr.msk.f32.vlgmr.msra.gmra.mrb[0].mxu0 %vm472_vm4, %v325_v7  ;;  %v330_v13 = vld [vmem:[%s299_s10 + $0x30] sm:$0xff]  ;;  %v331_v14 = vld [vmem:[%s299_s10 + $0x38] sm:$0xff]  ;;  %v335_v15 = vld [vmem:[%s314_s14] sm:$0xff] }
  0x15   : > { %797 = vmatprep.mubr.msk.f32.mxu1 %vm338_vm3, %v327_v10  ;;  %815 = vmatprep.mubr.msk.f32.mxu0 %vm472_vm4, %v326_v9 }
  0x18   : > { %798 = vmatmul.mubr.msk.f32.gmra.mrb[2].mxu1 %vm338_vm3, %v328_v11  ;;  %816 = vmatmul.mubr.msk.f32.gmra.mrb[2].mxu0 %vm472_vm4, %v327_v10 }
  0x19   : > { %800 = vmatprep.mubr.msk.f32.mxu1 %vm338_vm3, %v329_v12  ;;  %818 = vmatprep.mubr.msk.f32.mxu0 %vm472_vm4, %v328_v11 }
  0x1c   : > { %801 = vmatmul.mubr.msk.f32.gmra.mrb[4].mxu1 %vm338_vm3, %v330_v13  ;;  %819 = vmatmul.mubr.msk.f32.gmra.mrb[4].mxu0 %vm472_vm4, %v329_v12 }
  0x1d   : > { %803 = vmatprep.mubr.msk.f32.mxu1 %vm338_vm3, %v331_v14  ;;  %821 = vmatprep.mubr.msk.f32.mxu0 %vm472_vm4, %v330_v13 }
  0x20   : > { %804 = vmatmul.mubr.msk.f32.gmra.mrb[6].mxu1 %vm338_vm3, %v335_v15  ;;  %822 = vmatmul.mubr.msk.f32.gmra.mrb[6].mxu0 %vm472_vm4, %v331_v14 }
  0xe7   : > { %v796_v16 = vpop.f32.mrb[0].mxu1  ;;  %v814_v17 = vpop.f32.mrb[0].mxu0 }
  0xe8   : > { %v433_v18 = vpop.f32.mrb[1].mxu1  ;;  %v562_v19 = vadd.f32 %v814_v17, %v796_v16  ;;  %v556_v20 = vpop.f32.mrb[1].mxu0 }
  0xe9   : > { %v557_v22 = vadd.f32 %v556_v20, %v433_v18 }
  0xea   : > { %v603_v31 = vadd.f32 %v764_v21, %v562_v19 }
  0xeb   : > { %v799_v23 = vpop.f32.mrb[2].mxu1  ;;  %v602_v24 = vadd.f32 %v764_v21, %v557_v22  ;;  %v817_v25 = vpop.f32.mrb[2].mxu0 }
  0xec   : > { %v443_v26 = vpop.f32.mrb[3].mxu1  ;;  %v572_v27 = vadd.f32 %v817_v25, %v799_v23  ;;  %v566_v28 = vpop.f32.mrb[3].mxu0 }
  0xed   : > { %610 = vxpose.xlu0.b32.start [1/8] (short) (narrow) %v602_v24, 8  ;;  %v567_v29 = vadd.f32 %v566_v28, %v443_v26 }
  0xee   : > { %v605_v44 = vadd.f32 %v764_v21, %v572_v27 }
  0xef   : > { %v802_v30 = vpop.f32.mrb[4].mxu1  ;;  %v820_v32 = vpop.f32.mrb[4].mxu0  ;;  %v604_v36 = vadd.f32 %v764_v21, %v567_v29 }
  0xf0   : > { %v453_v33 = vpop.f32.mrb[5].mxu1  ;;  %v582_v34 = vadd.f32 %v820_v32, %v802_v30  ;;  %v576_v35 = vpop.f32.mrb[5].mxu0 }
  0xf1   : > { %611 = vxpose.xlu0.b32.cont [2/8] (short) (narrow) %v603_v31, 8  ;;  %v577_v37 = vadd.f32 %v576_v35, %v453_v33 }
  0xf2   : > { %v607_v46 = vadd.f32 %v764_v21, %v582_v34 }
  0xf3   : > { %v805_v38 = vpop.f32.mrb[6].mxu1  ;;  %v823_v39 = vpop.f32.mrb[6].mxu0  ;;  %v606_v45 = vadd.f32 %v764_v21, %v577_v37 }
  0xf4   : > { %v463_v40 = vpop.f32.mrb[7].mxu1  ;;  %v592_v41 = vadd.f32 %v823_v39, %v805_v38  ;;  %v586_v42 = vpop.f32.mrb[7].mxu0 }
  0xf5   : > { %612 = vxpose.xlu0.b32.cont [3/8] (short) (narrow) %v604_v36, 8  ;;  %v587_v43 = vadd.f32 %v586_v42, %v463_v40 }
  0xf6   : > { %v609_v48 = vadd.f32 %v764_v21, %v592_v41 }
  0xf7   : > { %v608_v47 = vadd.f32 %v764_v21, %v587_v43 }
  0xf9   : > { %613 = vxpose.xlu0.b32.cont [4/8] (short) (narrow) %v605_v44, 8 }
  0xfd   : > { %614 = vxpose.xlu0.b32.cont [5/8] (short) (narrow) %v606_v45, 8 }
 0x101   : > { %615 = vxpose.xlu0.b32.cont [6/8] (short) (narrow) %v607_v46, 8 }
 0x105   : > { %616 = vxpose.xlu0.b32.cont [7/8] (short) (narrow) %v608_v47, 8 }
 0x109   : > { %617 = vxpose.xlu0.b32.end [8/8] (short) (narrow) %v609_v48, 8 }
 0x16d   : > { %v626_v49 = vpop.trf.xlu0 }
 0x16e   : > { %643 = vst.msk [vmem:[%s323_s24] sm:$0xf] %vm642_vm5, %v626_v49 }
 0x16f PF: > { %s15_s20 = sadd.s32 1, %s893_s20   ;;  %s1006_s18 = smov %s889_s19 }
 0x170   : > { %p12_p5 = scmp.ge.s32.totalorder %s15_s20, 4   ;;  %s1007_s19 = smov %s1009_s21 }
 0x172   :  { %14 = sbr.rel (!%p12_p5) target bundleno = 2 (0x2), region = 73 }

</bundles_post_ra>
